<compile_context>
chip_gen: v7x
topology: tpu7x:2x2x1
jax: 0.10.0
libtpu: 0.0.40
codegen_flags: <defaults>
</compile_context>

<pallas_src>
import math
from functools import partial

import jax
import jax.numpy as jnp
from jax.experimental import pallas as pl
from jax.experimental.pallas import tpu as pltpu


# ----------------------------- parameter setup ------------------------------
def make_pe_table(max_len: int, d_model: int, dtype=jnp.float32):
    """Same construction as the PyTorch __init__, shape (max_len, d_model)."""
    position = jnp.arange(max_len, dtype=jnp.float32)[:, None]            # (L, 1)
    div_term = jnp.exp(
        jnp.arange(0, d_model, 2, dtype=jnp.float32) * (-math.log(10000.0) / d_model)
    )                                                                      # (D/2,)
    pe = jnp.zeros((max_len, d_model), dtype=jnp.float32)
    pe = pe.at[:, 0::2].set(jnp.sin(position * div_term))
    pe = pe.at[:, 1::2].set(jnp.cos(position * div_term))
    return pe.astype(dtype)


# ------------------------------ tile selection -------------------------------
_PIPELINE_BUDGET_BYTES = 12 * 1024 * 1024   # single-buffer footprint of all streams
_VMEM_LIMIT_BYTES = 48 * 1024 * 1024        # safe on v5e/v6e/v7x, above scoped defaults


def _choose_seq_tile(S, row_bytes, row_align):
    """Sequence-tile size: big enough that the ~0.35us/step overhead is noise,
    small enough that double-buffered streams fit under the VMEM limit; keep
    the sublane dim a multiple of the dtype pack (8/16/32 rows)."""
    if S <= row_align:
        return S
    rows = max(row_align, _PIPELINE_BUDGET_BYTES // max(1, row_bytes))
    ts = max(row_align, (min(rows, S) // row_align) * row_align)
    if ts >= S and S >= 2 * row_align:
        # Force >=2 grid steps so ("parallel",) can use both v7x TensorCores.
        ts = max(row_align, (((S + 1) // 2) // row_align) * row_align)
    return ts


# --------------------------------- kernels ----------------------------------
def _replicate_pe(pe, batch):
    # pe tile is (ts, D); x tile is (ts, B*D) with x_flat[s, b*D + d] = x[s, b, d].
    # Replicate pe B times along the lane dim (concatenate -> XLU, idle in this
    # kernel) instead of reading a Bx-sized pe from HBM or doing a sublane
    # broadcast of a (ts, B, D) temporary.
    if batch == 1:
        return pe
    return jnp.concatenate([pe] * batch, axis=-1)


def _pe_add_kernel(x_ref, pe_ref, o_ref, *, batch):
    pe = _replicate_pe(pe_ref[...], batch)
    o_ref[...] = (x_ref[...] + pe).astype(o_ref.dtype)


def _pe_add_dropout_kernel(x_ref, pe_ref, bits_ref, o_ref, *, batch, keep_thresh, scale):
    # Inverted dropout fused with the positional add.  Randomness comes in as a
    # uint32 stream; integer threshold compare keeps it to one select + mul.
    # TODO(synk): on a TPU-only deployment pltpu.prng_seed/prng_random_bits
    # inside the kernel would remove this extra HBM stream, but those
    # primitives have no CPU/interpret lowering, so the portable path streams
    # the bits in from the wrapper (jax.random.bits).
    pe = _replicate_pe(pe_ref[...], batch)
    y = x_ref[...] + pe
    keep = bits_ref[...] < jnp.uint32(keep_thresh)        # P(keep) = 1 - p
    o_ref[...] = jnp.where(keep, y * scale, 0.0).astype(o_ref.dtype)


# --------------------------------- wrapper -----------------------------------
def positional_encoding(x, pe_table, *, dropout_p=0.1, training=False, seed=0):
    """x: (S, B, D); pe_table: (max_len, D).  Returns (S, B, D)."""
    S, B, D = x.shape
    dtype = x.dtype
    itemsize = jnp.dtype(dtype).itemsize

    # Lane-dense layout: flatten (S, B, D) -> (S, B*D); contiguous, so free.
    x2 = x.reshape(S, B * D)
    pe = pe_table[:S].astype(dtype)                       # (S, D)

    use_dropout = bool(training) and float(dropout_p) > 0.0

    row_align = max(8, 32 // itemsize)                    # f32:8, bf16:16, int8:32
    row_bytes = B * D * itemsize * 2 + D * itemsize       # x in + out + pe
    if use_dropout:
        row_bytes += B * D * 4                            # uint32 bits stream
    ts = _choose_seq_tile(S, row_bytes, row_align)
    grid = (pl.cdiv(S, ts),)

    x_spec = pl.BlockSpec((ts, B * D), lambda i: (i, 0))
    pe_spec = pl.BlockSpec((ts, D), lambda i: (i, 0))
    bits_spec = pl.BlockSpec((ts, B * D), lambda i: (i, 0))
    cparams = pltpu.CompilerParams(
        dimension_semantics=("parallel",),
        vmem_limit_bytes=_VMEM_LIMIT_BYTES,
    )

    if not use_dropout:
        # eval-mode forward: dropout is identity.
        out2 = pl.pallas_call(
            partial(_pe_add_kernel, batch=B),
            out_shape=jax.ShapeDtypeStruct((S, B * D), dtype),
            grid=grid,
            in_specs=[x_spec, pe_spec],
            out_specs=x_spec,
            input_output_aliases={0: 0},   # reuse x's HBM buffer when donated
            compiler_params=cparams,
            cost_estimate=pl.CostEstimate(
                flops=S * B * D,
                transcendentals=0,
                bytes_accessed=(2 * S * B * D + S * D) * itemsize,
            ),
        )(x2, pe)
        return out2.reshape(S, B, D)

    p = float(dropout_p)
    # keep_thresh = round((1-p) * 2^32), clamped to uint32 max (bias <= 2^-32).
    keep_thresh = min((1 << 32) - 1, int(round((1.0 - p) * 4294967296.0)))
    scale = 1.0 / (1.0 - p)
    bits = jax.random.bits(jax.random.PRNGKey(seed), (S, B * D), dtype=jnp.uint32)

    out2 = pl.pallas_call(
        partial(_pe_add_dropout_kernel, batch=B, keep_thresh=keep_thresh, scale=scale),
        out_shape=jax.ShapeDtypeStruct((S, B * D), dtype),
        grid=grid,
        in_specs=[x_spec, pe_spec, bits_spec],
        out_specs=x_spec,
        input_output_aliases={0: 0},
        compiler_params=cparams,
        cost_estimate=pl.CostEstimate(
            flops=3 * S * B * D,
            transcendentals=0,
            bytes_accessed=(2 * S * B * D + S * D) * itemsize + S * B * D * 4,
        ),
    )(x2, pe, bits)
    return out2.reshape(S, B, D)


# ----------------------------------- main ------------------------------------
if __name__ == "__main__":
    d_model = 32
    seq_len = 8
    batch = 2
    max_len = 64  # small synthetic max_len (module default is 5000)

    key = jax.random.PRNGKey(0)
    x = jax.random.normal(key, (seq_len, batch, d_model), dtype=jnp.float32)
    pe_table = make_pe_table(max_len, d_model, dtype=jnp.float32)

    # pure-JAX reference
    ref = x + pe_table[:seq_len][:, None, :]

    # eval-mode forward (dropout = identity), matches module.eval() semantics
    out = positional_encoding(x, pe_table, dropout_p=0.1, training=False)
    out = jax.block_until_ready(out)
    assert out.shape == (seq_len, batch, d_model)
    assert jnp.allclose(out, ref, atol=1e-6, rtol=1e-6)

    # training-mode forward (inverted dropout): every element is either 0 or
    # (x + pe) / (1 - p).
    p = 0.1
    out_tr = positional_encoding(x, pe_table, dropout_p=p, training=True, seed=123)
    out_tr = jax.block_until_ready(out_tr)
    assert out_tr.shape == (seq_len, batch, d_model)
    scaled = ref * (1.0 / (1.0 - p))
    consistent = jnp.where(
        out_tr == 0.0, True, jnp.isclose(out_tr, scaled, atol=1e-5, rtol=1e-5)
    )
    assert bool(jnp.all(consistent))
    # Deterministic seed; with 512 elements at p=0.1 the drop fraction sits
    # comfortably inside (0, 0.5).
    zero_frac = float(jnp.mean((out_tr == 0.0).astype(jnp.float32)))
    assert 0.0 < zero_frac < 0.5

    print("KERNEL_OK")
</pallas_src>

<mosaic_0001>
module attributes {stable_mosaic.version = 11 : i64} {
  func.func @_pe_add_kernel(%arg0: i32, %arg1: memref<8x64xf32, #tpu.memory_space<vmem>>, %arg2: memref<8x32xf32, #tpu.memory_space<vmem>>, %arg3: memref<8x64xf32, #tpu.memory_space<vmem>>) attributes {dimension_semantics = [#tpu.dimension_semantics<parallel>], iteration_bounds = array<i64: 1>, scalar_prefetch = 0 : i64, scratch_operands = 0 : i64, tpu.core_type = #tpu.core_type<tc>, window_params = [{transform_indices = @transform_0, window_bounds = array<i64: 8, 64>}, {transform_indices = @transform_1, window_bounds = array<i64: 8, 32>}, {transform_indices = @transform_2, window_bounds = array<i64: 8, 64>}]} {
    %c0 = arith.constant 0 : index
    %c0_0 = arith.constant 0 : index
    %0 = vector.load %arg2[%c0, %c0_0] : memref<8x32xf32, #tpu.memory_space<vmem>>, vector<8x32xf32>
    %1 = tpu.concatenate %0, %0 in 1 : vector<8x32xf32>, vector<8x32xf32> -> vector<8x64xf32>
    %c0_1 = arith.constant 0 : index
    %c0_2 = arith.constant 0 : index
    %2 = vector.load %arg1[%c0_1, %c0_2] : memref<8x64xf32, #tpu.memory_space<vmem>>, vector<8x64xf32>
    %3 = arith.addf %2, %1 : vector<8x64xf32>
    %c0_3 = arith.constant 0 : index
    %c0_4 = arith.constant 0 : index
    %4 = vector.load %arg3[%c0_3, %c0_4] : memref<8x64xf32, #tpu.memory_space<vmem>>, vector<8x64xf32>
    tpu.vector_store %arg3[%c0_3, %c0_4], %3 {strides = array<i32>} : memref<8x64xf32, #tpu.memory_space<vmem>>, vector<8x64xf32>,
    return
  }
  func.func @transform_0(%arg0: i32) -> (i32, i32) {
    %c0_i32 = arith.constant 0 : i32
    %c0_i32_0 = arith.constant 0 : i32
    return %arg0, %c0_i32 : i32, i32
  }
  func.func @transform_1(%arg0: i32) -> (i32, i32) {
    %c0_i32 = arith.constant 0 : i32
    %c0_i32_0 = arith.constant 0 : i32
    return %arg0, %c0_i32 : i32, i32
  }
  func.func @transform_2(%arg0: i32) -> (i32, i32) {
    %c0_i32 = arith.constant 0 : i32
    %c0_i32_0 = arith.constant 0 : i32
    return %arg0, %c0_i32 : i32, i32
  }
}

</mosaic_0001>

<bundles_post_ra>
// kernel: tpu_custom_call.1
= control target key start
LH: loop header
LB: loop body
LE: loop exit
PB: predicated region body
PF: predicated region fallthrough
CT: control target
= control target key end

     0   :  { %7 = vsyncpa [#allocation3], 0  ;;  %s146_s0 = inlined_call_operand.hbm [shape: f32[8,64], index: 0, kind: input, shape index: {}, may-alias: {0,2}]   ;;  %s147_s1 = inlined_call_operand.vmem [shape: f32[8,32], index: 1, kind: input, shape index: {}]   ;;  %s148_s2 = inlined_call_operand.hbm [shape: f32[8,64], index: 2, kind: output, shape index: {}, may-alias: {0,2}]  }
   0x1   :  { %8 = vsyncpa [#allocation4], 0  ;;  %s101_s9 = smov [#allocation2]   ;;  %s53_s13 = scalar_lea.hbm %s146_s0, 128 }
   0x2   :  { %s15_s10 = sshll.u32 %s101_s9, 4  ;;  %p54_p0 = scmp.ne.s32.totalorder %s146_s0, %s53_s13  ;;  %s16_s10 = int_to_ptr.vmem [resolvable:$true] %s15_s10 }
   0x3   :  { %p57_p1 = scmp.lt.u32.totalorder %s53_s13, %s146_s0 }
   0x5   :  { %p59_p2 = pnand %p57_p1, %p54_p0 }
   0x7   :  { %62 = shalt.err (!%p59_p2)
}
   0x8   :  { %s63_s18 = scalar_lea.vmem %s16_s10, 128  ;;  %p68_p4 = scmp.lt.s32.totalorder %s16_s10, %s16_s10 }
   0x9   :  { %p64_p3 = scmp.ne.s32.totalorder %s16_s10, %s63_s18  ;;  %p69_p5 = scmp.lt.s32.totalorder %s63_s18, %s63_s18 }
   0xb   :  { %p70_p6 = por %p69_p5, %p68_p4 }
   0xd   :  { %p71_p7 = pnand %p70_p6, %p64_p3 }
   0xf   :  { %74 = shalt.err (!%p71_p7)
}
  0x10   :  { %18 = dma.hbm_to_vmem [thread:$0]  %s146_s0, 128, %s16_s10, [#allocation3]  }
  0x11   :  { %97 = dma.done.wait [#allocation3], 128  }
  0x12   :  { %98 = vsyncadd [#allocation3], 4294967168  ;;  %v24_v0 = vld [vmem:[%s147_s1] sm:$0xff]  ;;  %s102_s23 = smov 32   ;;  %vm29_vm0 = vcmask 261120   ;;  %s103_s24 = smov [#allocation5]  }
  0x13   :  { %26 = vrot.lane.b32.xlu0 %v24_v0, %s102_s23  ;;  %v31_v1 = vld [vmem:[#allocation2] sm:$0xff]  ;;  %s41_s25 = sshll.u32 %s103_s24, 4  ;;  %vm33_vm1 = vcmask 523264   ;;  %s42_s25 = int_to_ptr.vmem [resolvable:$true] %s41_s25 }
  0x14   :  { %s75_s26 = scalar_lea.vmem %s42_s25, 128  ;;  %p80_p9 = scmp.lt.s32.totalorder %s42_s25, %s42_s25 }
  0x15   :  { %p76_p8 = scmp.ne.s32.totalorder %s42_s25, %s75_s26  ;;  %p81_p10 = scmp.lt.s32.totalorder %s75_s26, %s75_s26 }
  0x17   :  { %p82_p11 = por %p81_p10, %p80_p9 }
  0x19   :  { %p83_p12 = pnand %p82_p11, %p76_p8 }
  0x85   :  { %v27_v2 = vpop.permute.xlu0 %26 }
  0x86   :  { %v30_v3 = vsel %vm29_vm0, %v24_v0, %v27_v2 }
  0x87   :  { %v32_v4 = vadd.f32 %v31_v1, %v30_v3 }
  0x89   :  { %34 = vst.msk [vmem:[#allocation5] sm:$0xff] %vm33_vm1, %v32_v4 }
  0x8a   :  { %86 = shalt.err (!%p83_p12)
}
  0x8b   :  { %s87_s27 = scalar_lea.hbm %s148_s2, 128 }
  0x8c   :  { %p88_p13 = scmp.ne.s32.totalorder %s148_s2, %s87_s27  ;;  %p91_p0 = scmp.lt.u32.totalorder %s87_s27, %s148_s2 }
  0x8e   :  { %p93_p1 = pnand %p91_p0, %p88_p13 }
  0x90   :  { %96 = shalt.err (!%p93_p1)
}
  0x91   :  { %44 = dma.vmem_to_hbm [thread:$0]  %s42_s25, 128, %s148_s2, [#allocation4]  }
  0x92   :  { %99 = dma.done.wait [#allocation4], 128  }
  0x93   :  { %100 = vsyncadd [#allocation4], 4294967168 }
  0x94   :  { %48 = vsyncpa [#allocation3], 1 }
  0x95   :  { %49 = vsyncpa [#allocation4], 1 }

</bundles_post_ra>
